<compile_context>
chip_gen: v5e
topology: v5e:2x2
jax: 0.10.0
libtpu: 0.0.40
codegen_flags: <defaults>
</compile_context>

<pallas_src>
import functools

import jax
import jax.numpy as jnp
from jax.experimental import pallas as pl
from jax.experimental.pallas import tpu as pltpu


def _round_up(v, m):
    return ((v + m - 1) // m) * m


def tail_pool_kernel(x_ref, w_ref, b_ref, o_ref, acc_ref, *,
                     use_relu, inv_hw, matmul_precision):
    """One (batch-tile, channel-tile) step of the pooled-linear forward.

    x_ref:   (TB, TC, HW)  compute dtype  -- raw feature-map tile
    w_ref:   (TC, HIDDEN)  compute dtype  -- fc2 weight, already transposed
    b_ref:   (1, HIDDEN)   float32        -- fc2 bias
    o_ref:   (TB, HIDDEN)  float32        -- output tile
    acc_ref: (TB, HIDDEN)  float32 scratch -- channel-axis accumulator
    """
    c = pl.program_id(1)

    @pl.when(c == 0)
    def _():
        acc_ref[...] = jnp.zeros_like(acc_ref)

    # AdaptiveAvgPool2d((1,1)): mean over the flattened H*W axis.  Sum and
    # 1/HW scale are done in f32 regardless of the (possibly bf16) storage
    # dtype; the scale is not folded into the bf16 weights.
    pooled = jnp.sum(x_ref[...].astype(jnp.float32), axis=-1) * inv_hw  # (TB, TC) f32
    pooled = pooled.astype(w_ref.dtype)

    # Linear(C, HIDDEN) partial product for this channel tile; f32 accumulate.
    acc_ref[...] += jnp.dot(pooled, w_ref[...],
                            preferred_element_type=jnp.float32,
                            precision=matmul_precision)

    @pl.when(c == pl.num_programs(1) - 1)
    def _():
        y = acc_ref[...] + b_ref[...]           # bias add in f32
        if use_relu:
            y = jnp.maximum(y, 0.0)
        o_ref[...] = y.astype(o_ref.dtype)


def prepare_tail_layer_3d_params(w_fc2, b_fc2, compute_dtype=jnp.bfloat16):
    """One-time parameter prep (hoisted out of the per-call path).

    w_fc2: (HIDDEN, C) fc2.weight; b_fc2: (HIDDEN,) fc2.bias.
    Returns (wt, bt): wt (C, HIDDEN) in compute_dtype, bt (1, HIDDEN) float32.
    """
    wt = jnp.transpose(w_fc2).astype(compute_dtype)
    bt = b_fc2.astype(jnp.float32).reshape(1, -1)
    return wt, bt


def _select_tiles(B, C, HW, hidden, ebytes, tb_max, vmem_budget_bytes):
    """Pick (TB, TC) under a VMEM budget (accounting for lane/sublane padding)."""
    sub = 8 * (4 // ebytes)              # row multiple: 8 f32, 16 bf16, 32 int8
    lanes_hw = _round_up(HW, 128)
    lanes_h = _round_up(hidden, 128)

    def footprint(tb, tc):
        x_buf = 2 * tb * _round_up(tc, sub) * lanes_hw * ebytes   # double-buffered
        w_buf = 2 * _round_up(tc, sub) * lanes_h * ebytes
        o_buf = 2 * _round_up(tb, 8) * lanes_h * 4
        acc = _round_up(tb, 8) * lanes_h * 4
        bias = 8 * lanes_h * 4
        return x_buf + w_buf + o_buf + acc + bias

    # Desired batch tile: big enough to pipeline, rounded for dtype packing,
    # capped so the "parallel" batch axis has >= 2 steps (v7x: 2 TensorCores).
    if B <= sub:
        tb_cands = [B]                    # full-extent leading block (always legal)
    else:
        tb = min(_round_up(min(B, tb_max), sub), _round_up(-(-B // 2), sub))
        tb = max(tb, sub)
        tb_cands = []
        t = tb
        while True:
            tb_cands.append(t)
            if t <= 8:
                break
            t = max(8, _round_up(t // 2, 8))

    # Channel tiles must divide C exactly (C is a reduction axis; edge-block
    # garbage would corrupt the accumulation) and respect sublane packing.
    tc_cands = [d for d in range(C, 0, -1)
                if C % d == 0 and (d % sub == 0 or d == C)]

    # Prefer an untiled channel axis (no extra weight re-DMA / grid revolutions);
    # within that, the largest batch tile that fits the budget.  Only tile C
    # when even the smallest batch tile overflows (realistic I3D channel dims).
    for tc in tc_cands:
        for tb in tb_cands:
            if footprint(tb, tc) <= vmem_budget_bytes:
                return tb, tc
    return tb_cands[-1], tc_cands[-1]


def tail_layer_3d_forward(x, wt, bt, *, use_relu=True, matmul_precision=None,
                          tb_max=512, vmem_budget_bytes=24 << 20,
                          block_b=None, block_c=None):
    """relu?(mean_{H,W}(x) @ wt + bt):  x (N,T,C,H,W) -> (N*T, HIDDEN) float32.

    wt, bt come from prepare_tail_layer_3d_params (wt's dtype is the storage /
    MXU input dtype; accumulation and epilogue are always f32).  Pass
    matmul_precision=jax.lax.Precision.HIGHEST with f32 params for strict f32
    matmul accuracy.
    """
    N, T, C, H, W = x.shape
    B = N * T
    HW = H * W
    hidden = wt.shape[1]
    assert wt.shape[0] == C and bt.shape == (1, hidden)

    cdt = wt.dtype
    ebytes = jnp.dtype(cdt).itemsize
    x3 = x.reshape(B, C, HW).astype(cdt)          # contiguous (B, C, HW) slab

    TB, TC = _select_tiles(B, C, HW, hidden, ebytes, tb_max, vmem_budget_bytes)
    if block_b is not None:
        TB = block_b
    if block_c is not None:
        TC = block_c
    assert C % TC == 0, "channel tile must divide C (reduction axis)"
    assert TB == B or TB % 8 == 0, "batch tile must be a multiple of 8 or full"
    grid = (pl.cdiv(B, TB), C // TC)

    cost = pl.CostEstimate(
        flops=2 * B * C * hidden + B * C * HW,
        transcendentals=0,
        bytes_accessed=(B * C * HW * ebytes                 # x
                        + grid[0] * C * hidden * ebytes     # weight per batch tile
                        + hidden * 4                        # bias
                        + B * hidden * 4),                  # output
    )

    kernel = functools.partial(tail_pool_kernel, use_relu=use_relu,
                               inv_hw=float(1.0 / HW),
                               matmul_precision=matmul_precision)

    # NOTE: when B % TB != 0 the last batch block computes on Pallas-padded /
    # undefined rows; this is only correct because rows are fully independent
    # and the padded rows are never written back to the (B, HIDDEN) output.
    # Do not add cross-row reductions to this kernel without revisiting this.
    out = pl.pallas_call(
        kernel,
        out_shape=jax.ShapeDtypeStruct((B, hidden), jnp.float32),
        grid_spec=pltpu.PrefetchScalarGridSpec(
            num_scalar_prefetch=0,
            grid=grid,
            in_specs=[
                pl.BlockSpec((TB, TC, HW), lambda i, c: (i, c, 0)),
                pl.BlockSpec((TC, hidden), lambda i, c: (c, 0)),
                pl.BlockSpec((1, hidden), lambda i, c: (0, 0)),
            ],
            out_specs=pl.BlockSpec((TB, hidden), lambda i, c: (i, 0)),
            scratch_shapes=[pltpu.VMEM((TB, hidden), jnp.float32)],
        ),
        compiler_params=pltpu.CompilerParams(
            dimension_semantics=("parallel", "arbitrary"),
            vmem_limit_bytes=64 << 20),
        cost_estimate=cost,
    )(x3, wt, bt)

    return out


if __name__ == "__main__":
    # Small shapes consistent with the module: N=2 clips, T=4 frames,
    # C = net.final_feat_dim = 64, H = W = ROI_XFORM_RESOLUTION = 7,
    # HIDDEN = cfg.FAST_RCNN.MLP_HEAD_DIM = 32.
    N, T, C, H, W = 2, 4, 64, 7, 7
    HIDDEN = 32

    key = jax.random.PRNGKey(0)
    kx, kw, kb = jax.random.split(key, 3)

    x = jax.random.normal(kx, (N, T, C, H, W), dtype=jnp.float32)

    # XavierFill (Glorot uniform) style fc2.weight; a small nonzero bias so the
    # bias-add path is actually exercised (the module itself inits it to 0).
    limit = float(jnp.sqrt(6.0 / (C + HIDDEN)))
    w_fc2 = jax.random.uniform(kw, (HIDDEN, C), dtype=jnp.float32,
                               minval=-limit, maxval=limit)
    b_fc2 = 0.1 * jax.random.normal(kb, (HIDDEN,), dtype=jnp.float32)

    # Pure-JAX reference (f32, highest matmul precision).
    pooled_ref = jnp.mean(x.reshape(N * T, C, H * W), axis=-1)
    lin_ref = jnp.dot(pooled_ref, w_fc2.T,
                      precision=jax.lax.Precision.HIGHEST) + b_fc2
    y_ref_relu = jnp.maximum(lin_ref, 0.0)

    # 1) Default bf16 storage path (f32 accumulate / epilogue).
    wt_bf16, bt = prepare_tail_layer_3d_params(w_fc2, b_fc2, jnp.bfloat16)
    y = jax.block_until_ready(
        tail_layer_3d_forward(x, wt_bf16, bt, use_relu=True))
    assert y.shape == (N * T, HIDDEN) and y.dtype == jnp.float32
    assert jnp.allclose(y, y_ref_relu, atol=2e-2, rtol=2e-2)

    # 2) f32 storage path.  Tolerance allows the default TPU matmul passes
    #    inside the kernel; request matmul_precision=HIGHEST for strict f32.
    wt_f32, _ = prepare_tail_layer_3d_params(w_fc2, b_fc2, jnp.float32)
    y32 = jax.block_until_ready(
        tail_layer_3d_forward(x, wt_f32, bt, use_relu=True))
    assert jnp.allclose(y32, y_ref_relu, atol=5e-3, rtol=5e-3)

    # 3) use_relu=False path.
    y_nr = jax.block_until_ready(
        tail_layer_3d_forward(x, wt_bf16, bt, use_relu=False))
    assert jnp.allclose(y_nr, lin_ref, atol=2e-2, rtol=2e-2)

    # 4) Force channel tiling (exercises the accumulator init/finalize path
    #    used when realistic I3D channel dims exceed the VMEM budget).
    y_ct = jax.block_until_ready(
        tail_layer_3d_forward(x, wt_bf16, bt, use_relu=True,
                              block_b=8, block_c=16))
    assert jnp.allclose(y_ct, y_ref_relu, atol=2e-2, rtol=2e-2)

    print("KERNEL_OK")
</pallas_src>

<mosaic_0001>
module attributes {stable_mosaic.version = 11 : i64} {
  func.func @tail_pool_kernel(%arg0: i32, %arg1: i32, %arg2: memref<8x64x49xbf16, #tpu.memory_space<vmem>>, %arg3: memref<64x32xbf16, #tpu.memory_space<vmem>>, %arg4: memref<1x32xf32, #tpu.memory_space<vmem>>, %arg5: memref<8x32xf32, #tpu.memory_space<vmem>>, %arg6: memref<8x32xf32, #tpu.memory_space<vmem>>) attributes {dimension_semantics = [#tpu.dimension_semantics<parallel>, #tpu.dimension_semantics<arbitrary>], iteration_bounds = array<i64: 1, 1>, scalar_prefetch = 0 : i64, scratch_operands = 1 : i64, tpu.core_type = #tpu.core_type<tc>, window_params = [{transform_indices = @transform_0, window_bounds = array<i64: 8, 64, 49>}, {transform_indices = @transform_1, window_bounds = array<i64: 64, 32>}, {pipeline_mode = #tpu.pipeline_mode<synchronous>, transform_indices = @transform_2, window_bounds = array<i64: 1, 32>}, {transform_indices = @transform_3, window_bounds = array<i64: 8, 32>}]} {
    %c0_i32 = arith.constant 0 : i32
    %0 = arith.cmpi eq, %arg1, %c0_i32 : i32
    %1 = arith.extui %0 : i1 to i32
    %c0_i32_0 = arith.constant 0 : i32
    %2 = arith.cmpi ne, %1, %c0_i32_0 : i32
    scf.if %2 {
      %cst_13 = arith.constant 0.000000e+00 : f32
      %17 = vector.broadcast %cst_13 : f32 to vector<8x32xf32>
      %c0_14 = arith.constant 0 : index
      %c0_15 = arith.constant 0 : index
      %18 = vector.load %arg6[%c0_14, %c0_15] : memref<8x32xf32, #tpu.memory_space<vmem>>, vector<8x32xf32>
      tpu.vector_store %arg6[%c0_14, %c0_15], %17 {strides = array<i32>} : memref<8x32xf32, #tpu.memory_space<vmem>>, vector<8x32xf32>,
    } else {
    }
    %c0 = arith.constant 0 : index
    %c0_1 = arith.constant 0 : index
    %c0_2 = arith.constant 0 : index
    %3 = vector.load %arg2[%c0, %c0_1, %c0_2] : memref<8x64x49xbf16, #tpu.memory_space<vmem>>, vector<8x64x49xbf16>
    %4 = arith.extf %3 : vector<8x64x49xbf16> to vector<8x64x49xf32>
    %cst = arith.constant dense<0.000000e+00> : vector<8x64xf32>
    %5 = vector.multi_reduction <add>, %4, %cst [2] : vector<8x64x49xf32> to vector<8x64xf32>
    %cst_3 = arith.constant 0.0204081628 : f32
    %6 = vector.broadcast %cst_3 : f32 to vector<8x64xf32>
    %7 = arith.mulf %5, %6 : vector<8x64xf32>
    %8 = arith.truncf %7 : vector<8x64xf32> to vector<8x64xbf16>
    %c0_4 = arith.constant 0 : index
    %c0_5 = arith.constant 0 : index
    %9 = vector.load %arg6[%c0_4, %c0_5] : memref<8x32xf32, #tpu.memory_space<vmem>>, vector<8x32xf32>
    %c0_6 = arith.constant 0 : index
    %c0_7 = arith.constant 0 : index
    %10 = vector.load %arg3[%c0_6, %c0_7] : memref<64x32xbf16, #tpu.memory_space<vmem>>, vector<64x32xbf16>
    %cst_8 = arith.constant dense<0.000000e+00> : vector<8x32xf32>
    %11 = tpu.matmul %8, %10, %cst_8 {dimension_numbers = #tpu.dot_dimension_numbers<[1], [0], [0], [1], [0, 0, 1, 1], [], []>} : vector<8x64xbf16>, vector<64x32xbf16>, vector<8x32xf32> -> vector<8x32xf32>
    %12 = arith.addf %9, %11 : vector<8x32xf32>
    %c0_9 = arith.constant 0 : index
    %c0_10 = arith.constant 0 : index
    %13 = vector.load %arg6[%c0_9, %c0_10] : memref<8x32xf32, #tpu.memory_space<vmem>>, vector<8x32xf32>
    tpu.vector_store %arg6[%c0_9, %c0_10], %12 {strides = array<i32>} : memref<8x32xf32, #tpu.memory_space<vmem>>, vector<8x32xf32>,
    %c0_i32_11 = arith.constant 0 : i32
    %14 = arith.cmpi eq, %arg1, %c0_i32_11 : i32
    %15 = arith.extui %14 : i1 to i32
    %c0_i32_12 = arith.constant 0 : i32
    %16 = arith.cmpi ne, %15, %c0_i32_12 : i32
    scf.if %16 {
      %c0_13 = arith.constant 0 : index
      %c0_14 = arith.constant 0 : index
      %17 = vector.load %arg6[%c0_13, %c0_14] : memref<8x32xf32, #tpu.memory_space<vmem>>, vector<8x32xf32>
      %c0_15 = arith.constant 0 : index
      %c0_16 = arith.constant 0 : index
      %18 = vector.load %arg4[%c0_15, %c0_16] : memref<1x32xf32, #tpu.memory_space<vmem>>, vector<1x32xf32>
      %19 = vector.broadcast %18 : vector<1x32xf32> to vector<8x32xf32>
      %20 = arith.addf %17, %19 : vector<8x32xf32>
      %cst_17 = arith.constant 0.000000e+00 : f32
      %21 = vector.broadcast %cst_17 : f32 to vector<8x32xf32>
      %22 = arith.maximumf %20, %21 : vector<8x32xf32>
      %c0_18 = arith.constant 0 : index
      %c0_19 = arith.constant 0 : index
      %23 = vector.load %arg5[%c0_18, %c0_19] : memref<8x32xf32, #tpu.memory_space<vmem>>, vector<8x32xf32>
      tpu.vector_store %arg5[%c0_18, %c0_19], %22 {strides = array<i32>} : memref<8x32xf32, #tpu.memory_space<vmem>>, vector<8x32xf32>,
    } else {
    }
    return
  }
  func.func @transform_0(%arg0: i32, %arg1: i32) -> (i32, i32, i32) {
    %c0_i32 = arith.constant 0 : i32
    %c0_i32_0 = arith.constant 0 : i32
    return %arg0, %arg1, %c0_i32 : i32, i32, i32
  }
  func.func @transform_1(%arg0: i32, %arg1: i32) -> (i32, i32) {
    %c0_i32 = arith.constant 0 : i32
    %c0_i32_0 = arith.constant 0 : i32
    return %arg1, %c0_i32 : i32, i32
  }
  func.func @transform_2(%arg0: i32, %arg1: i32) -> (i32, i32) {
    %c0_i32 = arith.constant 0 : i32
    %c0_i32_0 = arith.constant 0 : i32
    %c0_i32_1 = arith.constant 0 : i32
    return %c0_i32, %c0_i32_0 : i32, i32
  }
  func.func @transform_3(%arg0: i32, %arg1: i32) -> (i32, i32) {
    %c0_i32 = arith.constant 0 : i32
    %c0_i32_0 = arith.constant 0 : i32
    return %arg0, %c0_i32 : i32, i32
  }
}

</mosaic_0001>

<bundles_post_ra>
// kernel: tpu_custom_call.1
= control target key start
LH: loop header
LB: loop body
LE: loop exit
PB: predicated region body
PF: predicated region fallthrough
CT: control target
= control target key end

     0   :  { %vm150_vm0 = vcmask 400384   ;;  %s1351_s0 = inlined_call_operand.vmem [shape: bf16[8,64,49], index: 0, kind: input, shape index: {}]   ;;  %s1352_s1 = inlined_call_operand.vmem [shape: bf16[64,32], index: 1, kind: input, shape index: {}]   ;;  %s1353_s2 = inlined_call_operand.vmem [shape: f32[1,32], index: 2, kind: input, shape index: {}]   ;;  %s1354_s3 = inlined_call_operand.hbm [shape: f32[8,32], index: 3, kind: output, shape index: {}]  }
   0x1   :  { %v918_v0 = vld [vmem:[%s1351_s0 + $0x20] sm:$0xff]   ;;  %v915_v1 = vld [vmem:[%s1351_s0 + $0x8] sm:$0xff]  }
   0x2   :  { %v788_v2 = vld [vmem:[%s1351_s0] sm:$0xff]   ;;  %v805_v3 = vunpack.c.l.bf16 %v918_v0  ;;  %v793_v4 = vunpack.c.l.bf16 %v915_v1 }
   0x3   :  { %v789_v5 = vunpack.c.l.bf16 %v788_v2 }
   0x4   :  { %8 = vsyncpa [#allocation4], 0  ;;  %v175_v6 = vsel %vm150_vm0, %v805_v3, 0.0  ;;  %v157_v7 = vsel %vm150_vm0, %v793_v4, 0.0  ;;  %v806_v9 = vunpack.c.h.bf16 %v918_v0  ;;  %v794_v10 = vunpack.c.h.bf16 %v915_v1  ;;  %v919_v15 = vld [vmem:[%s1351_s0 + $0x28] sm:$0xff]   ;;  %v922_v16 = vld [vmem:[%s1351_s0 + $0x40] sm:$0xff]  }
   0x5   :  { %v151_v8 = vsel %vm150_vm0, %v789_v5, 0.0  ;;  %176 = vadd.xlane.f32.xlu1 %v175_v6  ;;  %158 = vadd.xlane.f32.xlu2 %v157_v7  ;;  %v790_v11 = vunpack.c.h.bf16 %v788_v2  ;;  %v810_v17 = vunpack.c.h.bf16 %v919_v15  ;;  %v821_v18 = vunpack.c.l.bf16 %v922_v16  ;;  %v923_v23 = vld [vmem:[%s1351_s0 + $0x48] sm:$0xff]   ;;  %v926_v30 = vld [vmem:[%s1351_s0 + $0x60] sm:$0xff]   ;;  %v916_v31 = vld [vmem:[%s1351_s0 + $0x10] sm:$0xff]   ;;  %s976_s30 = smov [#allocation3]   ;;  %s757_s7 = sshll.u32 %s1354_s3, 4  ;;  %s758_s7 = int_to_ptr.hbm [resolvable:$true] %s757_s7 }
   0x6   :  { %152 = vadd.xlane.f32.xlu0 %v151_v8  ;;  %v178_v12 = vsel %vm150_vm0, %v806_v9, 0.0  ;;  %v160_v13 = vsel %vm150_vm0, %v794_v10, 0.0  ;;  %v809_v19 = vunpack.c.l.bf16 %v919_v15  ;;  %v825_v24 = vunpack.c.l.bf16 %v923_v23  ;;  %v920_v38 = vld [vmem:[%s1351_s0 + $0x30] sm:$0xff]   ;;  %v927_v45 = vld [vmem:[%s1351_s0 + $0x68] sm:$0xff]   ;;  %v930_v46 = vld [vmem:[%s1351_s0 + $0x80] sm:$0xff]   ;;  %s755_s4 = sshll.u32 %s976_s30, 4  ;;  %s756_s4 = int_to_ptr.vmem [resolvable:$true] %s755_s4 }
   0x7   :  { %v154_v14 = vsel %vm150_vm0, %v790_v11, 0.0  ;;  %v184_v20 = vsel %vm150_vm0, %v810_v17, 0.0  ;;  %v199_v21 = vsel %vm150_vm0, %v821_v18, 0.0  ;;  %v826_v25 = vunpack.c.h.bf16 %v923_v23  ;;  %v924_v53 = vld [vmem:[%s1351_s0 + $0x50] sm:$0xff]   ;;  %v931_v60 = vld [vmem:[%s1351_s0 + $0x88] sm:$0xff]   ;;  %v934_v61 = vld [vmem:[%s1351_s0 + $0xa0] sm:$0xff]  }
   0x8   :  { %v181_v22 = vsel %vm150_vm0, %v809_v19, 0.0  ;;  %v822_v26 = vunpack.c.h.bf16 %v922_v16  ;;  %v205_v27 = vsel %vm150_vm0, %v825_v24, 0.0  ;;  %v838_v32 = vunpack.c.h.bf16 %v926_v30  ;;  %v917_v4 = vld [vmem:[%s1351_s0 + $0x18] sm:$0xff]   ;;  %v935_v19 = vld [vmem:[%s1351_s0 + $0xa8] sm:$0xff]  }
   0x9   :  { %v208_v28 = vsel %vm150_vm0, %v826_v25, 0.0  ;;  %v797_v33 = vunpack.c.l.bf16 %v916_v31  ;;  %v837_v34 = vunpack.c.l.bf16 %v926_v30  ;;  %v813_v39 = vunpack.c.l.bf16 %v920_v38  ;;  %v921_v11 = vld [vmem:[%s1351_s0 + $0x38] sm:$0xff]  }
   0xa   :  { %v202_v29 = vsel %vm150_vm0, %v822_v26, 0.0  ;;  %v226_v35 = vsel %vm150_vm0, %v838_v32, 0.0  ;;  %v814_v40 = vunpack.c.h.bf16 %v920_v38  ;;  %v798_v41 = vunpack.c.h.bf16 %v916_v31  ;;  %v938_v26 = vld [vmem:[%s1351_s0 + $0xc0] sm:$0xff]  }
   0xb   :  { %v163_v36 = vsel %vm150_vm0, %v797_v33, 0.0  ;;  %v223_v37 = vsel %vm150_vm0, %v837_v34, 0.0  ;;  %v187_v42 = vsel %vm150_vm0, %v813_v39, 0.0  ;;  %v842_v47 = vunpack.c.h.bf16 %v927_v45  ;;  %v932_v34 = vld [vmem:[%s1351_s0 + $0x90] sm:$0xff]  }
   0xc   :  { %v190_v43 = vsel %vm150_vm0, %v814_v40, 0.0  ;;  %v166_v44 = vsel %vm150_vm0, %v798_v41, 0.0  ;;  %v853_v48 = vunpack.c.l.bf16 %v930_v46  ;;  %v841_v49 = vunpack.c.l.bf16 %v927_v45  ;;  %v939_v41 = vld [vmem:[%s1351_s0 + $0xc8] sm:$0xff]  }
   0xd   :  { %179 = vadd.xlane.f32.xlu1 %v178_v12  ;;  %161 = vadd.xlane.f32.xlu2 %v160_v13  ;;  %v232_v50 = vsel %vm150_vm0, %v842_v47, 0.0  ;;  %v829_v54 = vunpack.c.l.bf16 %v924_v53  ;;  %v830_v55 = vunpack.c.h.bf16 %v924_v53  ;;  %v854_v56 = vunpack.c.h.bf16 %v930_v46  ;;  %v928_v12 = vld [vmem:[%s1351_s0 + $0x70] sm:$0xff]  }
   0xe   :  { %155 = vadd.xlane.f32.xlu0 %v154_v14  ;;  %v247_v51 = vsel %vm150_vm0, %v853_v48, 0.0  ;;  %v229_v52 = vsel %vm150_vm0, %v841_v49, 0.0  ;;  %v858_v62 = vunpack.c.h.bf16 %v931_v60  ;;  %v869_v63 = vunpack.c.l.bf16 %v934_v61  ;;  %v929_v49 = vld [vmem:[%s1351_s0 + $0x78] sm:$0xff]  }
   0xf   :  { %v211_v57 = vsel %vm150_vm0, %v829_v54, 0.0  ;;  %v214_v58 = vsel %vm150_vm0, %v830_v55, 0.0  ;;  %v250_v59 = vsel %vm150_vm0, %v854_v56, 0.0  ;;  %v857_v0 = vunpack.c.l.bf16 %v931_v60 }
  0x10   :  { %v256_v1 = vsel %vm150_vm0, %v858_v62, 0.0  ;;  %v271_v2 = vsel %vm150_vm0, %v869_v63, 0.0  ;;  %v801_v5 = vunpack.c.l.bf16 %v917_v4  ;;  %v802_v6 = vunpack.c.h.bf16 %v917_v4 }
  0x11   :  { %v253_v3 = vsel %vm150_vm0, %v857_v0, 0.0  ;;  %v870_v7 = vunpack.c.h.bf16 %v934_v61  ;;  %v818_v13 = vunpack.c.h.bf16 %v921_v11  ;;  %v845_v14 = vunpack.c.l.bf16 %v928_v12  ;;  %v943_v61 = vld [vmem:[%s1351_s0 + $0xe8] sm:$0xff]  }
  0x12   :  { %v169_v8 = vsel %vm150_vm0, %v801_v5, 0.0  ;;  %v172_v9 = vsel %vm150_vm0, %v802_v6, 0.0  ;;  %v817_v15 = vunpack.c.l.bf16 %v921_v11  ;;  %v885_v30 = vunpack.c.l.bf16 %v938_v26 }
  0x13   :  { %v274_v10 = vsel %vm150_vm0, %v870_v7, 0.0  ;;  %v196_v16 = vsel %vm150_vm0, %v818_v13, 0.0  ;;  %v235_v17 = vsel %vm150_vm0, %v845_v14, 0.0  ;;  %v889_v45 = vunpack.c.l.bf16 %v939_v41  ;;  %v933_v13 = vld [vmem:[%s1351_s0 + $0x98] sm:$0xff]  }
  0x14   :  { %v193_v18 = vsel %vm150_vm0, %v817_v15, 0.0  ;;  %v295_v33 = vsel %vm150_vm0, %v885_v30, 0.0  ;;  %v544_v60 = vlaneseq  ;;  %v905_v63 = vunpack.c.l.bf16 %v943_v61 }
  0x15   :  { %185 = vadd.xlane.f32.xlu1 %v184_v20  ;;  %200 = vadd.xlane.f32.xlu2 %v199_v21  ;;  %v873_v20 = vunpack.c.l.bf16 %v935_v19  ;;  %v874_v21 = vunpack.c.h.bf16 %v935_v19  ;;  %v301_v48 = vsel %vm150_vm0, %v889_v45, 0.0  ;;  %vm549_vm1 = vcmask 130112   ;;  %v937_v45 = vld [vmem:[%s1351_s0 + $0xb8] sm:$0xff]  }
  0x16   :  { %182 = vadd.xlane.f32.xlu0 %v181_v22  ;;  %v846_v22 = vunpack.c.h.bf16 %v928_v12  ;;  %v325_v12 = vsel %vm150_vm0, %v905_v63, 0.0  ;;  %vm553_vm2 = vcmask 195712   ;;  %vm557_vm3 = vcmask 261312  }
  0x17   :  { %v277_v23 = vsel %vm150_vm0, %v873_v20, 0.0  ;;  %v280_v24 = vsel %vm150_vm0, %v874_v21, 0.0  ;;  %vm561_vm4 = vcmask 326912   ;;  %vm565_vm5 = vcmask 392512  }
  0x18   :  { %v238_v25 = vsel %vm150_vm0, %v846_v22, 0.0  ;;  %v865_v22 = vunpack.c.l.bf16 %v933_v13  ;;  %vm569_vm6 = vcmask 458112   ;;  %vm573_vm7 = vcmask 523712  }
  0x19   :  { %vm680_vm8 = vcmask 1041409   ;;  %vm682_vm9 = vcmask 1042434   ;;  %vm684_vm10 = vcmask 1043459   ;;  %vm686_vm11 = vcmask 1044484  }
  0x1a   :  { %vm20_vm12 = vcmask 261120   ;;  %vm688_vm13 = vcmask 1045509   ;;  %vm690_vm14 = vcmask 1046534   ;;  %vm692_vm15 = vcmask 1047559  }
  0x1d   :  { %206 = vadd.xlane.f32.xlu1 %v205_v27  ;;  %209 = vadd.xlane.f32.xlu2 %v208_v28  ;;  %v925_v27 = vld [vmem:[%s1351_s0 + $0x58] sm:$0xff]   ;;  %v886_v28 = vunpack.c.h.bf16 %v938_v26  ;;  %v866_v26 = vunpack.c.h.bf16 %v933_v13 }
  0x1e   :  { %203 = vadd.xlane.f32.xlu0 %v202_v29  ;;  %v833_v29 = vunpack.c.l.bf16 %v925_v27 }
  0x1f   :  { %v298_v31 = vsel %vm150_vm0, %v886_v28, 0.0  ;;  %v906_v28 = vunpack.c.h.bf16 %v943_v61 }
  0x20   :  { %v217_v32 = vsel %vm150_vm0, %v833_v29, 0.0 }
  0x25   :  { %227 = vadd.xlane.f32.xlu1 %v226_v35  ;;  %164 = vadd.xlane.f32.xlu2 %v163_v36  ;;  %v861_v35 = vunpack.c.l.bf16 %v932_v34  ;;  %v862_v36 = vunpack.c.h.bf16 %v932_v34 }
  0x26   :  { %224 = vadd.xlane.f32.xlu0 %v223_v37  ;;  %v834_v37 = vunpack.c.h.bf16 %v925_v27 }
  0x27   :  { %v259_v38 = vsel %vm150_vm0, %v861_v35, 0.0  ;;  %v262_v39 = vsel %vm150_vm0, %v862_v36, 0.0 }
  0x28   :  { %v220_v40 = vsel %vm150_vm0, %v834_v37, 0.0  ;;  %v265_v37 = vsel %vm150_vm0, %v865_v22, 0.0 }
  0x2d   :  { %188 = vadd.xlane.f32.xlu1 %v187_v42  ;;  %191 = vadd.xlane.f32.xlu2 %v190_v43  ;;  %v942_v42 = vld [vmem:[%s1351_s0 + $0xe0] sm:$0xff]   ;;  %v890_v43 = vunpack.c.h.bf16 %v939_v41  ;;  %v268_v41 = vsel %vm150_vm0, %v866_v26, 0.0 }
  0x2e   :  { %167 = vadd.xlane.f32.xlu0 %v166_v44  ;;  %v901_v44 = vunpack.c.l.bf16 %v942_v42 }
  0x2f   :  { %v304_v46 = vsel %vm150_vm0, %v890_v43, 0.0  ;;  %v328_v43 = vsel %vm150_vm0, %v906_v28, 0.0 }
  0x30   :  { %v319_v47 = vsel %vm150_vm0, %v901_v44, 0.0  ;;  %v940_v44 = vld [vmem:[%s1351_s0 + $0xd0] sm:$0xff]  }
  0x35   :  { %233 = vadd.xlane.f32.xlu1 %v232_v50  ;;  %248 = vadd.xlane.f32.xlu2 %v247_v51  ;;  %v849_v50 = vunpack.c.l.bf16 %v929_v49  ;;  %v850_v51 = vunpack.c.h.bf16 %v929_v49 }
  0x36   :  { %230 = vadd.xlane.f32.xlu0 %v229_v52  ;;  %v902_v52 = vunpack.c.h.bf16 %v942_v42 }
  0x37   :  { %v241_v56 = vsel %vm150_vm0, %v849_v50, 0.0 }
  0x3d   :  { %212 = vadd.xlane.f32.xlu1 %v211_v57  ;;  %215 = vadd.xlane.f32.xlu2 %v214_v58  ;;  %v244_v57 = vsel %vm150_vm0, %v850_v51, 0.0  ;;  %v936_v58 = vld [vmem:[%s1351_s0 + $0xb0] sm:$0xff]  }
  0x3e   :  { %251 = vadd.xlane.f32.xlu0 %v250_v59  ;;  %v322_v59 = vsel %vm150_vm0, %v902_v52, 0.0  ;;  %v878_v62 = vunpack.c.h.bf16 %v936_v58  ;;  %v894_v52 = vunpack.c.h.bf16 %v940_v44 }
  0x45   :  { %257 = vadd.xlane.f32.xlu1 %v256_v1  ;;  %272 = vadd.xlane.f32.xlu2 %v271_v2  ;;  %v1123_v2 = vand.u32 127, %v544_v60 }
  0x46   :  { %254 = vadd.xlane.f32.xlu0 %v253_v3  ;;  %v877_v3 = vunpack.c.l.bf16 %v936_v58 }
  0x47   :  { %v1131_v15 = vadd.s32 4294967280, %v1123_v2  ;;  %v1138_v20 = vadd.s32 4294967272, %v1123_v2 }
  0x4d   :  { %170 = vadd.xlane.f32.xlu1 %v169_v8  ;;  %173 = vadd.xlane.f32.xlu2 %v172_v9  ;;  %v286_v9 = vsel %vm150_vm0, %v878_v62, 0.0 }
  0x4e   :  { %275 = vadd.xlane.f32.xlu0 %v274_v10 }
  0x55   :  { %197 = vadd.xlane.f32.xlu1 %v196_v16  ;;  %236 = vadd.xlane.f32.xlu2 %v235_v17  ;;  %v283_v17 = vsel %vm150_vm0, %v877_v3, 0.0  ;;  %v310_v3 = vsel %vm150_vm0, %v894_v52, 0.0  ;;  %v1197_v52 = vadd.s32 4294967256, %v1123_v2 }
  0x56   :  { %194 = vadd.xlane.f32.xlu0 %v193_v18  ;;  %v1135_v18 = vadd.s32 4294967288, %v1123_v2 }
  0x5d   :  { %278 = vadd.xlane.f32.xlu1 %v277_v23  ;;  %281 = vadd.xlane.f32.xlu2 %v280_v24 }
  0x5e   :  { %239 = vadd.xlane.f32.xlu0 %v238_v25 }
  0x65   :  { %299 = vadd.xlane.f32.xlu1 %v298_v31  ;;  %218 = vadd.xlane.f32.xlu2 %v217_v32 }
  0x66   :  { %296 = vadd.xlane.f32.xlu0 %v295_v33 }
  0x6d   :  { %260 = vadd.xlane.f32.xlu1 %v259_v38  ;;  %263 = vadd.xlane.f32.xlu2 %v262_v39 }
  0x6e   :  { %221 = vadd.xlane.f32.xlu0 %v220_v40 }
  0x75   :  { %305 = vadd.xlane.f32.xlu1 %v304_v46  ;;  %320 = vadd.xlane.f32.xlu2 %v319_v47 }
  0x76   :  { %302 = vadd.xlane.f32.xlu0 %v301_v48 }
  0x78   :  { %v177_v53 = vpop.xlane.xlu1 %176  ;;  %v159_v54 = vpop.xlane.xlu2 %158 }
  0x79   :  { %v153_v55 = vpop.xlane.xlu0 %152  ;;  %v351_v0 = vmul.f32 0.020408163, %v177_v53  ;;  %v345_v1 = vmul.f32 0.020408163, %v159_v54  ;;  %v881_v53 = vunpack.c.l.bf16 %v937_v45  ;;  %v893_v54 = vunpack.c.l.bf16 %v940_v44 }
  0x7a   :  { %v343_v10 = vmul.f32 0.020408163, %v153_v55 }
  0x7d   :  { %242 = vadd.xlane.f32.xlu1 %v241_v56  ;;  %245 = vadd.xlane.f32.xlu2 %v244_v57 }
  0x7e   :  { %323 = vadd.xlane.f32.xlu0 %v322_v59 }
  0x80   :  { %v180_v4 = vpop.xlane.xlu1 %179  ;;  %v162_v5 = vpop.xlane.xlu2 %161 }
  0x81   :  { %v352_v6 = vmul.f32 0.020408163, %v180_v4  ;;  %v346_v7 = vmul.f32 0.020408163, %v162_v5  ;;  %v156_v8 = vpop.xlane.xlu0 %155  ;;  %v289_v4 = vsel %vm150_vm0, %v881_v53, 0.0 }
  0x82   :  { %v344_v11 = vmul.f32 0.020408163, %v156_v8  ;;  %v944_v8 = vld [vmem:[%s1351_s0 + $0xf0] sm:$0xff]  }
  0x83   :  { %v411_v14 = vpack.c.bf16 %v352_v6, %v351_v0  ;;  %v408_v16 = vpack.c.bf16 %v346_v7, %v345_v1  ;;  %v307_v7 = vsel %vm150_vm0, %v893_v54, 0.0 }
  0x84   :  { %v407_v19 = vpack.c.bf16 %v344_v11, %v343_v10 }
  0x85   :  { %v482_v21 = vunpack.c.l.b16 %v408_v16  ;;  %287 = vadd.xlane.f32.xlu1 %v286_v9  ;;  %326 = vadd.xlane.f32.xlu2 %v325_v12  ;;  %v483_v23 = vunpack.c.h.b16 %v408_v16  ;;  %v488_v33 = vunpack.c.l.b16 %v411_v14  ;;  %v489_v34 = vunpack.c.h.b16 %v411_v14 }
  0x86   :  { %v480_v24 = vunpack.c.l.b16 %v407_v19  ;;  %v481_v25 = vunpack.c.h.b16 %v407_v19  ;;  %284 = vadd.xlane.f32.xlu0 %v283_v17  ;;  %v909_v14 = vunpack.c.l.bf16 %v944_v8  ;;  %v910_v16 = vunpack.c.h.bf16 %v944_v8 }
  0x87   :  { %v552_v27 = vperm.slane %v482_v21, %v1131_v15  ;;  %v556_v38 = vperm.slane %v483_v23, %v1138_v20  ;;  %v575_v48 = vperm.slane %v488_v33, %v1123_v2  ;;  %v576_v49 = vperm.slane %v489_v34, %v1135_v18  ;;  %v941_v34 = vld [vmem:[%s1351_s0 + $0xd8] sm:$0xff]  }
  0x88   :  { %v546_v29 = vperm.slane %v480_v24, %v1123_v2  ;;  %v548_v30 = vperm.slane %v481_v25, %v1135_v18  ;;  %v186_v31 = vpop.xlane.xlu1 %185  ;;  %v201_v32 = vpop.xlane.xlu2 %200  ;;  %v882_v19 = vunpack.c.h.bf16 %v937_v45 }
  0x89   :  { %v354_v35 = vmul.f32 0.020408163, %v186_v31  ;;  %v183_v36 = vpop.xlane.xlu0 %182  ;;  %v359_v55 = vmul.f32 0.020408163, %v201_v32  ;;  %v577_v60 = vsel %vm549_vm1, %v576_v49, %v575_v48  ;;  %v334_v31 = vsel %vm150_vm0, %v910_v16, 0.0 }
  0x8a   :  { %v550_v39 = vsel %vm549_vm1, %v548_v30, %v546_v29  ;;  %v353_v40 = vmul.f32 0.020408163, %v183_v36  ;;  %v331_v30 = vsel %vm150_vm0, %v909_v14, 0.0  ;;  %v292_v33 = vsel %vm150_vm0, %v882_v19, 0.0 }
  0x8b   :  { %v554_v42 = vsel %vm553_vm2, %v552_v27, %v550_v39 }
  0x8c   :  { %v412_v46 = vpack.c.bf16 %v354_v35, %v353_v40  ;;  %v1156_v47 = vsel %vm557_vm3, %v556_v38, %v554_v42  ;;  %v945_v35 = vld [vmem:[%s1351_s0 + $0xf8] sm:$0xff]   ;;  %v898_v38 = vunpack.c.h.bf16 %v941_v34  ;;  %v897_v40 = vunpack.c.l.bf16 %v941_v34 }
  0x8d   :  { %266 = vadd.xlane.f32.xlu1 %v265_v37  ;;  %269 = vadd.xlane.f32.xlu2 %v268_v41  ;;  %v913_v39 = vunpack.c.l.bf16 %v945_v35 }
  0x8e   :  { %v490_v50 = vunpack.c.l.b16 %v412_v46  ;;  %v491_v51 = vunpack.c.h.b16 %v412_v46  ;;  %329 = vadd.xlane.f32.xlu0 %v328_v43  ;;  %v316_v49 = vsel %vm150_vm0, %v898_v38, 0.0  ;;  %v313_v54 = vsel %vm150_vm0, %v897_v40, 0.0 }
  0x90   :  { %v578_v56 = vperm.slane %v490_v50, %v1131_v15  ;;  %v580_v57 = vperm.slane %v491_v51, %v1138_v20  ;;  %v207_v58 = vpop.xlane.xlu1 %206  ;;  %v210_v59 = vpop.xlane.xlu2 %209  ;;  %v337_v50 = vsel %vm150_vm0, %v913_v39, 0.0  ;;  %v1194_v51 = vadd.s32 4294967264, %v1123_v2 }
  0x91   :  { %v361_v61 = vmul.f32 0.020408163, %v207_v58  ;;  %v362_v62 = vmul.f32 0.020408163, %v210_v59  ;;  %v204_v63 = vpop.xlane.xlu0 %203 }
  0x92   :  { %v579_v0 = vsel %vm553_vm2, %v578_v56, %v577_v60  ;;  %v360_v1 = vmul.f32 0.020408163, %v204_v63 }
  0x93   :  { %v1167_v5 = vsel %vm557_vm3, %v580_v57, %v579_v0  ;;  %v416_v6 = vpack.c.bf16 %v362_v62, %v361_v61  ;;  %v914_v62 = vunpack.c.h.bf16 %v945_v35 }
  0x94   :  { %v415_v9 = vpack.c.bf16 %v360_v1, %v359_v55 }
  0x95   :  { %v498_v10 = vunpack.c.l.b16 %v416_v6  ;;  %v499_v11 = vunpack.c.h.b16 %v416_v6  ;;  %311 = vadd.xlane.f32.xlu1 %v310_v3  ;;  %290 = vadd.xlane.f32.xlu2 %v289_v4  ;;  %v340_v14 = vsel %vm150_vm0, %v914_v62, 0.0  ;;  %vm719_vm0 = vcmask 523264  }
  0x96   :  { %v496_v12 = vunpack.c.l.b16 %v415_v9  ;;  %v497_v13 = vunpack.c.h.b16 %v415_v9  ;;  %308 = vadd.xlane.f32.xlu0 %v307_v7 }
  0x97   :  { %v593_v17 = vperm.slane %v498_v10, %v1131_v15  ;;  %v595_v21 = vperm.slane %v499_v11, %v1138_v20 }
  0x98   :  { %v590_v22 = vperm.slane %v496_v12, %v1123_v2  ;;  %v591_v23 = vperm.slane %v497_v13, %v1135_v18  ;;  %v228_v24 = vpop.xlane.xlu1 %227  ;;  %v165_v25 = vpop.xlane.xlu2 %164 }
  0x99   :  { %v368_v26 = vmul.f32 0.020408163, %v228_v24  ;;  %v225_v27 = vpop.xlane.xlu0 %224  ;;  %v347_v41 = vmul.f32 0.020408163, %v165_v25 }
  0x9a   :  { %v592_v28 = vsel %vm549_vm1, %v591_v23, %v590_v22  ;;  %v367_v29 = vmul.f32 0.020408163, %v225_v27 }
  0x9b   :  { %v594_v32 = vsel %vm553_vm2, %v593_v17, %v592_v28 }
  0x9c   :  { %v419_v36 = vpack.c.bf16 %v368_v26, %v367_v29  ;;  %v1189_v37 = vsel %vm557_vm3, %v595_v21, %v594_v32 }
  0x9d   :  { %332 = vadd.xlane.f32.xlu1 %v331_v30  ;;  %335 = vadd.xlane.f32.xlu2 %v334_v31 }
  0x9e   :  { %293 = vadd.xlane.f32.xlu0 %v292_v33  ;;  %v504_v4 = vunpack.c.l.b16 %v419_v36  ;;  %v505_v6 = vunpack.c.h.b16 %v419_v36 }
  0xa0   :  { %v189_v42 = vpop.xlane.xlu1 %188  ;;  %v192_v43 = vpop.xlane.xlu2 %191  ;;  %v605_v17 = vperm.slane %v504_v4, %v1123_v2  ;;  %v606_v19 = vperm.slane %v505_v6, %v1135_v18  ;;  %v1241_v6 = vadd.s32 4294967248, %v1123_v2 }
  0xa1   :  { %v355_v44 = vmul.f32 0.020408163, %v189_v42  ;;  %v356_v45 = vmul.f32 0.020408163, %v192_v43  ;;  %v168_v46 = vpop.xlane.xlu0 %167 }
  0xa2   :  { %v348_v48 = vmul.f32 0.020408163, %v168_v46  ;;  %v607_v26 = vsel %vm549_vm1, %v606_v19, %v605_v17 }
  0xa3   :  { %v413_v53 = vpack.c.bf16 %v356_v45, %v355_v44 }
  0xa4   :  { %v409_v55 = vpack.c.bf16 %v348_v48, %v347_v41 }
  0xa5   :  { %v492_v56 = vunpack.c.l.b16 %v413_v53  ;;  %v493_v57 = vunpack.c.h.b16 %v413_v53  ;;  %317 = vadd.xlane.f32.xlu1 %v316_v49  ;;  %338 = vadd.xlane.f32.xlu2 %v337_v50 }
  0xa6   :  { %v484_v58 = vunpack.c.l.b16 %v409_v55  ;;  %v485_v59 = vunpack.c.h.b16 %v409_v55  ;;  %314 = vadd.xlane.f32.xlu0 %v313_v54 }
  0xa7   :  { %v582_v60 = vperm.slane %v492_v56, %v1194_v51  ;;  %v584_v61 = vperm.slane %v493_v57, %v1197_v52 }
  0xa8   :  { %v560_v63 = vperm.slane %v484_v58, %v1194_v51  ;;  %v564_v0 = vperm.slane %v485_v59, %v1197_v52  ;;  %v234_v1 = vpop.xlane.xlu1 %233  ;;  %v249_v3 = vpop.xlane.xlu2 %248 }
  0xa9   :  { %v583_v7 = vsel %vm561_vm4, %v582_v60, %v1167_v5  ;;  %v370_v8 = vmul.f32 0.020408163, %v234_v1  ;;  %v231_v9 = vpop.xlane.xlu0 %230  ;;  %v375_v22 = vmul.f32 0.020408163, %v249_v3 }
  0xaa   :  { %v1207_v10 = vsel %vm565_vm5, %v584_v61, %v583_v7  ;;  %v562_v11 = vsel %vm561_vm4, %v560_v63, %v1156_v47  ;;  %v369_v12 = vmul.f32 0.020408163, %v231_v9  ;;  %v1244_v7 = vadd.s32 4294967240, %v1123_v2 }
  0xab   :  { %v1212_v13 = vsel %vm565_vm5, %v564_v0, %v562_v11 }
  0xac   :  { %v420_v16 = vpack.c.bf16 %v370_v8, %v369_v12 }
  0xae   :  { %v506_v5 = vunpack.c.l.b16 %v420_v16  ;;  %v507_v21 = vunpack.c.h.b16 %v420_v16  ;;  %341 = vadd.xlane.f32.xlu0 %v340_v14 }
  0xb0   :  { %v608_v23 = vperm.slane %v506_v5, %v1131_v15  ;;  %v610_v24 = vperm.slane %v507_v21, %v1138_v20  ;;  %v213_v47 = vpop.xlane.xlu1 %212  ;;  %v216_v25 = vpop.xlane.xlu2 %215 }
  0xb1   :  { %v363_v27 = vmul.f32 0.020408163, %v213_v47  ;;  %v364_v28 = vmul.f32 0.020408163, %v216_v25  ;;  %v252_v29 = vpop.xlane.xlu0 %251 }
  0xb2   :  { %v609_v30 = vsel %vm553_vm2, %v608_v23, %v607_v26  ;;  %v376_v31 = vmul.f32 0.020408163, %v252_v29 }
  0xb3   :  { %v1222_v32 = vsel %vm557_vm3, %v610_v24, %v609_v30  ;;  %v417_v33 = vpack.c.bf16 %v364_v28, %v363_v27 }
  0xb4   :  { %v423_v34 = vpack.c.bf16 %v376_v31, %v375_v22 }
  0xb5   :  { %v500_v35 = vunpack.c.l.b16 %v417_v33  ;;  %v501_v36 = vunpack.c.h.b16 %v417_v33 }
  0xb6   :  { %v512_v43 = vunpack.c.l.b16 %v423_v34  ;;  %v513_v44 = vunpack.c.h.b16 %v423_v34 }
  0xb7   :  { %v597_v38 = vperm.slane %v500_v35, %v1194_v51  ;;  %v599_v39 = vperm.slane %v501_v36, %v1197_v52 }
  0xb8   :  { %v258_v40 = vpop.xlane.xlu1 %257  ;;  %v273_v41 = vpop.xlane.xlu2 %272  ;;  %v620_v53 = vperm.slane %v512_v43, %v1123_v2  ;;  %v621_v54 = vperm.slane %v513_v44, %v1135_v18 }
  0xb9   :  { %v598_v42 = vsel %vm561_vm4, %v597_v38, %v1189_v37  ;;  %v378_v45 = vmul.f32 0.020408163, %v258_v40  ;;  %v255_v46 = vpop.xlane.xlu0 %254  ;;  %v383_v57 = vmul.f32 0.020408163, %v273_v41 }
  0xba   :  { %v1229_v48 = vsel %vm565_vm5, %v599_v39, %v598_v42  ;;  %v377_v49 = vmul.f32 0.020408163, %v255_v46  ;;  %v622_v61 = vsel %vm549_vm1, %v621_v54, %v620_v53 }
  0xbc   :  { %v424_v50 = vpack.c.bf16 %v378_v45, %v377_v49 }
  0xbe   :  { %v514_v55 = vunpack.c.l.b16 %v424_v50  ;;  %v515_v56 = vunpack.c.h.b16 %v424_v50 }
  0xc0   :  { %v623_v58 = vperm.slane %v514_v55, %v1131_v15  ;;  %v625_v37 = vperm.slane %v515_v56, %v1138_v20  ;;  %v171_v59 = vpop.xlane.xlu1 %170  ;;  %v174_v60 = vpop.xlane.xlu2 %173 }
  0xc1   :  { %v349_v62 = vmul.f32 0.020408163, %v171_v59  ;;  %v350_v63 = vmul.f32 0.020408163, %v174_v60  ;;  %v276_v0 = vpop.xlane.xlu0 %275 }
  0xc2   :  { %v624_v1 = vsel %vm553_vm2, %v623_v58, %v622_v61  ;;  %v384_v3 = vmul.f32 0.020408163, %v276_v0 }
  0xc3   :  { %v1238_v4 = vsel %vm557_vm3, %v625_v37, %v624_v1  ;;  %v410_v8 = vpack.c.bf16 %v350_v63, %v349_v62 }
  0xc4   :  { %v427_v9 = vpack.c.bf16 %v384_v3, %v383_v57 }
  0xc5   :  { %v486_v11 = vunpack.c.l.b16 %v410_v8  ;;  %v487_v12 = vunpack.c.h.b16 %v410_v8 }
  0xc6   :  { %v520_v27 = vunpack.c.l.b16 %v427_v9  ;;  %v521_v28 = vunpack.c.h.b16 %v427_v9 }
  0xc7   :  { %v568_v14 = vperm.slane %v486_v11, %v1241_v6  ;;  %v572_v16 = vperm.slane %v487_v12, %v1244_v7 }
  0xc8   :  { %v198_v17 = vpop.xlane.xlu1 %197  ;;  %v237_v19 = vpop.xlane.xlu2 %236  ;;  %v635_v42 = vperm.slane %v520_v27, %v1123_v2  ;;  %v636_v43 = vperm.slane %v521_v28, %v1135_v18 }
  0xc9   :  { %v570_v5 = vsel %vm569_vm6, %v568_v14, %v1212_v13  ;;  %v358_v21 = vmul.f32 0.020408163, %v198_v17  ;;  %v195_v22 = vpop.xlane.xlu0 %194  ;;  %v371_v29 = vmul.f32 0.020408163, %v237_v19 }
  0xca   :  { %v574_v23 = vsel %vm573_vm7, %v572_v16, %v570_v5  ;;  %v357_v24 = vmul.f32 0.020408163, %v195_v22 }
  0xcc   :  { %v414_v47 = vpack.c.bf16 %v358_v21, %v357_v24 }
  0xce   :  { %v494_v25 = vunpack.c.l.b16 %v414_v47  ;;  %v495_v26 = vunpack.c.h.b16 %v414_v47 }
  0xd0   :  { %v586_v30 = vperm.slane %v494_v25, %v1241_v6  ;;  %v588_v31 = vperm.slane %v495_v26, %v1244_v7  ;;  %v279_v33 = vpop.xlane.xlu1 %278  ;;  %v282_v34 = vpop.xlane.xlu2 %281 }
  0xd1   :  { %v385_v35 = vmul.f32 0.020408163, %v279_v33  ;;  %v386_v13 = vmul.f32 0.020408163, %v282_v34  ;;  %v240_v36 = vpop.xlane.xlu0 %239 }
  0xd2   :  { %v587_v38 = vsel %vm569_vm6, %v586_v30, %v1207_v10  ;;  %v372_v39 = vmul.f32 0.020408163, %v240_v36  ;;  %v637_v10 = vsel %vm549_vm1, %v636_v43, %v635_v42  ;;  %v786_v43 = vld [vmem:[%s1352_s1 + $0x18] sm:$0xff] }
  0xd3   :  { %v589_v40 = vsel %vm573_vm7, %v588_v31, %v587_v38  ;;  %v428_v41 = vpack.c.bf16 %v386_v13, %v385_v35  ;;  %727 = vmatpush.bf16.msra.mxu0 %v786_v43 }
  0xd4   :  { %v681_v44 = vsel %vm680_vm8, %v589_v40, %v574_v23  ;;  %v421_v45 = vpack.c.bf16 %v372_v39, %v371_v29 }
  0xd5   :  { %v522_v46 = vunpack.c.l.b16 %v428_v41  ;;  %v523_v49 = vunpack.c.h.b16 %v428_v41 }
  0xd6   :  { %v508_v50 = vunpack.c.l.b16 %v421_v45  ;;  %v509_v53 = vunpack.c.h.b16 %v421_v45 }
  0xd7   :  { %v638_v54 = vperm.slane %v522_v46, %v1131_v15  ;;  %v640_v55 = vperm.slane %v523_v49, %v1138_v20 }
  0xd8   :  { %v612_v56 = vperm.slane %v508_v50, %v1194_v51  ;;  %v614_v57 = vperm.slane %v509_v53, %v1197_v52  ;;  %v300_v58 = vpop.xlane.xlu1 %299  ;;  %v219_v37 = vpop.xlane.xlu2 %218 }
  0xd9   :  { %v639_v59 = vsel %vm553_vm2, %v638_v54, %v637_v10  ;;  %v297_v60 = vpop.xlane.xlu0 %296  ;;  %v365_v0 = vmul.f32 0.020408163, %v219_v37 }
  0xda   :  { %v1265_v61 = vsel %vm557_vm3, %v640_v55, %v639_v59  ;;  %v613_v62 = vsel %vm561_vm4, %v612_v56, %v1222_v32  ;;  %v785_v55 = vld [vmem:[%s1352_s1 + $0x10] sm:$0xff]  ;;  %v392_v56 = vmul.f32 0.020408163, %v300_v58 }
  0xdb   :  { %v615_v63 = vsel %vm565_vm5, %v614_v57, %v613_v62  ;;  %v391_v57 = vmul.f32 0.020408163, %v297_v60  ;;  %728 = vmatpush.bf16.msra.mxu0 %v785_v55 }
  0xdd   :  { %v431_v60 = vpack.c.bf16 %v392_v56, %v391_v57 }
  0xe0   :  { %v261_v1 = vpop.xlane.xlu1 %260  ;;  %v264_v3 = vpop.xlane.xlu2 %263 }
  0xe1   :  { %v222_v8 = vpop.xlane.xlu0 %221  ;;  %v379_v29 = vmul.f32 0.020408163, %v261_v1  ;;  %v380_v30 = vmul.f32 0.020408163, %v264_v3  ;;  %v784_v3 = vld [vmem:[%s1352_s1 + $0x8] sm:$0xff] }
  0xe2   :  { %v366_v9 = vmul.f32 0.020408163, %v222_v8  ;;  %729 = vmatpush.bf16.msra.mxu0 %v784_v3 }
  0xe3   :  { %v425_v13 = vpack.c.bf16 %v380_v30, %v379_v29 }
  0xe4   :  { %v418_v11 = vpack.c.bf16 %v366_v9, %v365_v0 }
  0xe5   :  { %v516_v42 = vunpack.c.l.b16 %v425_v13 }
  0xe6   :  { %v502_v12 = vunpack.c.l.b16 %v418_v11  ;;  %v503_v14 = vunpack.c.h.b16 %v418_v11 }
  0xe7   :  { %v627_v45 = vperm.slane %v516_v42, %v1194_v51 }
  0xe8   :  { %v601_v16 = vperm.slane %v502_v12, %v1241_v6  ;;  %v603_v17 = vperm.slane %v503_v14, %v1244_v7  ;;  %v306_v19 = vpop.xlane.xlu1 %305  ;;  %v1272_v5 = vpop.xlane.xlu2 %320  ;;  %v783_v14 = vld [vmem:[%s1352_s1] sm:$0xff] }
  0xe9   :  { %v303_v21 = vpop.xlane.xlu0 %302  ;;  %v628_v37 = vsel %vm561_vm4, %v627_v45, %v1238_v4  ;;  %v394_v8 = vmul.f32 0.020408163, %v306_v19  ;;  %730 = vmatpush.bf16.msra.mxu0 %v783_v14  ;;  %v399_v29 = vmul.f32 0.020408163, %v1272_v5 }
  0xea   :  { %v602_v32 = vsel %vm569_vm6, %v601_v16, %v1229_v48  ;;  %v393_v9 = vmul.f32 0.020408163, %v303_v21 }
  0xeb   :  { %v604_v22 = vsel %vm573_vm7, %v603_v17, %v602_v32 }
  0xec   :  { %v683_v23 = vsel %vm682_vm9, %v604_v22, %v681_v44  ;;  %v517_v44 = vunpack.c.h.b16 %v425_v13  ;;  %v432_v22 = vpack.c.bf16 %v394_v8, %v393_v9 }
  0xee   :  { %v629_v59 = vperm.slane %v517_v44, %v1197_v52  ;;  %v530_v30 = vunpack.c.l.b16 %v432_v22  ;;  %v531_v44 = vunpack.c.h.b16 %v432_v22 }
  0xf0   :  { %v243_v24 = vpop.xlane.xlu1 %242  ;;  %v246_v47 = vpop.xlane.xlu2 %245  ;;  %v630_v4 = vsel %vm565_vm5, %v629_v59, %v628_v37 }
  0xf1   :  { %v373_v25 = vmul.f32 0.020408163, %v243_v24  ;;  %v374_v26 = vmul.f32 0.020408163, %v246_v47  ;;  %v324_v27 = vpop.xlane.xlu0 %323  ;;  %v528_v24 = vunpack.c.l.b16 %v431_v60  ;;  %v529_v47 = vunpack.c.h.b16 %v431_v60 }
  0xf3   :  { %v422_v28 = vpack.c.bf16 %v374_v26, %v373_v25 }
  0xf5   :  { %v510_v31 = vunpack.c.l.b16 %v422_v28  ;;  %v511_v33 = vunpack.c.h.b16 %v422_v28 }
  0xf7   :  { %v616_v34 = vperm.slane %v510_v31, %v1241_v6  ;;  %v618_v35 = vperm.slane %v511_v33, %v1244_v7  ;;  %v400_v31 = vmul.f32 0.020408163, %v324_v27  ;;  %v650_v33 = vperm.slane %v528_v24, %v1123_v2 }
  0xf8   :  { %v288_v36 = vpop.xlane.xlu1 %287  ;;  %v327_v48 = vpop.xlane.xlu2 %326  ;;  %v653_v27 = vperm.slane %v530_v30, %v1131_v15 }
  0xf9   :  { %v617_v38 = vsel %vm569_vm6, %v616_v34, %v615_v63  ;;  %v285_v39 = vpop.xlane.xlu0 %284  ;;  %v388_v62 = vmul.f32 0.020408163, %v288_v36  ;;  %v651_v34 = vperm.slane %v529_v47, %v1135_v18  ;;  %v435_v45 = vpack.c.bf16 %v400_v31, %v399_v29 }
  0xfa   :  { %v619_v40 = vsel %vm573_vm7, %v618_v35, %v617_v38  ;;  %v387_v63 = vmul.f32 0.020408163, %v285_v39  ;;  %v401_v35 = vmul.f32 0.020408163, %v327_v48  ;;  %v975_v38 = vmov 0.0  }
  0xfb   :  { %v685_v41 = vsel %vm684_vm10, %v619_v40, %v683_v23  ;;  %21 = vst.msk [vmem:[#allocation2] sm:$0xff] %vm20_vm12, %v975_v38 }
  0xfc   :  { %v429_v16 = vpack.c.bf16 %v388_v62, %v387_v63  ;;  %v655_v62 = vperm.slane %v531_v44, %v1138_v20  ;;  %v536_v63 = vunpack.c.l.b16 %v435_v45 }
  0xfe   :  { %v524_v25 = vunpack.c.l.b16 %v429_v16  ;;  %v525_v39 = vunpack.c.h.b16 %v429_v16 }
 0x100   :  { %v267_v46 = vpop.xlane.xlu1 %266  ;;  %v270_v49 = vpop.xlane.xlu2 %269  ;;  %v642_v40 = vperm.slane %v524_v25, %v1194_v51 }
 0x101   :  { %v381_v50 = vmul.f32 0.020408163, %v267_v46  ;;  %v382_v53 = vmul.f32 0.020408163, %v270_v49  ;;  %v330_v54 = vpop.xlane.xlu0 %329  ;;  %v652_v49 = vsel %vm549_vm1, %v651_v34, %v650_v33 }
 0x102   :  { %v654_v59 = vsel %vm553_vm2, %v653_v27, %v652_v49 }
 0x103   :  { %v426_v10 = vpack.c.bf16 %v382_v53, %v381_v50  ;;  %v643_v50 = vsel %vm561_vm4, %v642_v40, %v1265_v61  ;;  %v644_v53 = vperm.slane %v525_v39, %v1197_v52  ;;  %v656_v24 = vsel %vm557_vm3, %v655_v62, %v654_v59 }
 0x105   :  { %v518_v0 = vunpack.c.l.b16 %v426_v10  ;;  %v519_v1 = vunpack.c.h.b16 %v426_v10  ;;  %v645_v61 = vsel %vm565_vm5, %v644_v53, %v643_v50 }
 0x107   :  { %v631_v11 = vperm.slane %v518_v0, %v1241_v6  ;;  %v633_v58 = vperm.slane %v519_v1, %v1244_v7  ;;  %v537_v0 = vunpack.c.h.b16 %v435_v45 }
 0x108   :  { %v312_v12 = vpop.xlane.xlu1 %311  ;;  %v291_v32 = vpop.xlane.xlu2 %290 }
 0x109   :  { %v632_v17 = vsel %vm569_vm6, %v631_v11, %v630_v4  ;;  %v309_v19 = vpop.xlane.xlu0 %308  ;;  %v396_v26 = vmul.f32 0.020408163, %v312_v12  ;;  %v389_v13 = vmul.f32 0.020408163, %v291_v32  ;;  %v665_v32 = vperm.slane %v536_v63, %v1123_v2 }
 0x10a   :  { %v634_v21 = vsel %vm573_vm7, %v633_v58, %v632_v17  ;;  %v395_v28 = vmul.f32 0.020408163, %v309_v19  ;;  %v666_v19 = vperm.slane %v537_v0, %v1135_v18 }
 0x10b   :  { %v687_v23 = vsel %vm686_vm11, %v634_v21, %v685_v41  ;;  %v402_v41 = vmul.f32 0.020408163, %v330_v54 }
 0x10c   :  { %v433_v42 = vpack.c.bf16 %v396_v26, %v395_v28  ;;  %v667_v34 = vsel %vm549_vm1, %v666_v19, %v665_v32 }
 0x10d   :  { %v436_v55 = vpack.c.bf16 %v402_v41, %v401_v35 }
 0x10e   :  { %v532_v10 = vunpack.c.l.b16 %v433_v42  ;;  %v533_v11 = vunpack.c.h.b16 %v433_v42 }
 0x10f   :  { %v538_v9 = vunpack.c.l.b16 %v436_v55  ;;  %v539_v47 = vunpack.c.h.b16 %v436_v55 }
 0x110   :  { %v333_v36 = vpop.xlane.xlu1 %332  ;;  %v336_v46 = vpop.xlane.xlu2 %335  ;;  %v657_v4 = vperm.slane %v532_v10, %v1194_v51  ;;  %v659_v26 = vperm.slane %v533_v11, %v1197_v52 }
 0x111   :  { %v294_v43 = vpop.xlane.xlu0 %293  ;;  %v403_v56 = vmul.f32 0.020408163, %v333_v36  ;;  %v404_v54 = vmul.f32 0.020408163, %v336_v46  ;;  %v668_v25 = vperm.slane %v538_v9, %v1131_v15  ;;  %v670_v35 = vperm.slane %v539_v47, %v1138_v20 }
 0x112   :  { %v390_v5 = vmul.f32 0.020408163, %v294_v43  ;;  %v658_v29 = vsel %vm561_vm4, %v657_v4, %v656_v24 }
 0x113   :  { %v437_v12 = vpack.c.bf16 %v404_v54, %v403_v56  ;;  %v669_v38 = vsel %vm553_vm2, %v668_v25, %v667_v34 }
 0x114   :  { %v430_v48 = vpack.c.bf16 %v390_v5, %v389_v13  ;;  %v660_v13 = vsel %vm565_vm5, %v659_v26, %v658_v29  ;;  %v671_v44 = vsel %vm557_vm3, %v670_v35, %v669_v38 }
 0x115   :  { %v540_v30 = vunpack.c.l.b16 %v437_v12  ;;  %v541_v15 = vunpack.c.h.b16 %v437_v12 }
 0x116   :  { %v526_v57 = vunpack.c.l.b16 %v430_v48  ;;  %v527_v37 = vunpack.c.h.b16 %v430_v48 }
 0x117   :  { %v672_v39 = vperm.slane %v540_v30, %v1194_v51  ;;  %v674_v20 = vperm.slane %v541_v15, %v1197_v52  ;;  %v439_v52 = vld [vmem:[#allocation2] sm:$0xff] }
 0x118   :  { %v646_v1 = vperm.slane %v526_v57, %v1241_v6  ;;  %v648_v3 = vperm.slane %v527_v37, %v1244_v7  ;;  %v318_v8 = vpop.xlane.xlu1 %317  ;;  %v339_v28 = vpop.xlane.xlu2 %338 }
 0x119   :  { %v398_v58 = vmul.f32 0.020408163, %v318_v8  ;;  %v315_v60 = vpop.xlane.xlu0 %314  ;;  %v673_v27 = vsel %vm561_vm4, %v672_v39, %v671_v44 }
 0x11a   :  { %v647_v14 = vsel %vm569_vm6, %v646_v1, %v645_v61  ;;  %v397_v16 = vmul.f32 0.020408163, %v315_v60  ;;  %v675_v51 = vsel %vm565_vm5, %v674_v20, %v673_v27 }
 0x11b   :  { %v649_v17 = vsel %vm573_vm7, %v648_v3, %v647_v14 }
 0x11c   :  { %v434_v21 = vpack.c.bf16 %v398_v58, %v397_v16  ;;  %v689_v22 = vsel %vm688_vm13, %v649_v17, %v687_v23  ;;  %v405_v23 = vmul.f32 0.020408163, %v339_v28 }
 0x11e   :  { %v534_v31 = vunpack.c.l.b16 %v434_v21  ;;  %v535_v33 = vunpack.c.h.b16 %v434_v21 }
 0x120   :  { %v661_v2 = vperm.slane %v534_v31, %v1241_v6  ;;  %v663_v18 = vperm.slane %v535_v33, %v1244_v7 }
 0x121   :  { %v342_v36 = vpop.xlane.xlu0 %341 }
 0x122   :  { %v406_v40 = vmul.f32 0.020408163, %v342_v36  ;;  %v662_v41 = vsel %vm569_vm6, %v661_v2, %v660_v13 }
 0x123   :  { %v664_v42 = vsel %vm573_vm7, %v663_v18, %v662_v41 }
 0x124   :  { %v438_v43 = vpack.c.bf16 %v406_v40, %v405_v23  ;;  %v691_v5 = vsel %vm690_vm14, %v664_v42, %v689_v22 }
 0x126   :  { %v542_v45 = vunpack.c.l.b16 %v438_v43  ;;  %v543_v46 = vunpack.c.h.b16 %v438_v43 }
 0x128   :  { %v676_v49 = vperm.slane %v542_v45, %v1241_v6  ;;  %v678_v48 = vperm.slane %v543_v46, %v1244_v7  ;;  %v948_v6 = vld [vmem:[%s1353_s2] ss:$0 sm:$0xff] }
 0x12a   :  { %v677_v50 = vsel %vm569_vm6, %v676_v49, %v675_v51 }
 0x12b   :  { %v679_v53 = vsel %vm573_vm7, %v678_v48, %v677_v50 }
 0x12c   :  { %v693_v55 = vsel %vm692_vm15, %v679_v53, %v691_v5 }
 0x12d   :  { %v694_v10 = vpack.c.b16 %v693_v55, %v693_v55 }
 0x12f   :  { %782 = vmatmul.msk.bf16.vlgmr.msra.gmra.mxu0 %vm719_vm0, %v694_v10 }
 0x1ac   :  { %v732_v56 = vpop.f32.mrf.mxu0 }
 0x1ad   :  { %v736_v54 = vadd.f32 %v732_v56, %v439_v52 }
 0x1af   :  { %738 = vst.msk [vmem:[#allocation2] sm:$0xff] %vm20_vm12, %v736_v54 }
 0x1b4   :  { %v734_v7 = vpop.f32.mrf.mxu0 }
 0x1b6   :  { %v742_v57 = vld [vmem:[#allocation2] sm:$0xff] }
 0x1b7   :  { %v747_v37 = vadd.f32 %v948_v6, %v742_v57 }
 0x1b9   :  { %v748_v59 = vmax.f32 %v747_v37, 0.0 }
 0x1bb   :  { %749 = vst.msk [vmem:[#allocation3] sm:$0xff] %vm20_vm12, %v748_v59 }
 0x1bc   :  { %760 = dma.vmem_to_hbm [thread:$0]  %s756_s4, 128, %s758_s7, [#allocation4]  }
 0x1bd   :  { %973 = dma.done.wait [#allocation4], 128  }
 0x1be   :  { %974 = vsyncadd [#allocation4], 4294967168 }
 0x1bf   :  { %765 = vsyncpa [#allocation4], 1 }

</bundles_post_ra>
